<compile_context>
chip_gen: v6e
topology: v6e:2x2x1
jax: 0.10.0
libtpu: 0.0.40
codegen_flags: <defaults>
</compile_context>

<pallas_src>
import jax
import jax.numpy as jnp
from jax.experimental import pallas as pl
from jax.experimental.pallas import tpu as pltpu


def _sse_kernel(w_ref, x_ref, o_ref):
    # x_ref: (C, T) = channels x spatial tile for the current (batch, tile) step
    #        (batch dim squeezed out via the BlockSpec).
    # w_ref: (1, C) 1x1-conv weight (bias-free), pre-cast to the input dtype.
    x = x_ref[...]                                                   # (C, T), native dtype

    # 1x1 conv over channels == (1, C) @ (C, T) on the MXU, f32 accumulation.
    q = jnp.dot(w_ref[...], x, preferred_element_type=jnp.float32)  # (1, T) f32
    q = jax.nn.sigmoid(q)                                            # EUP

    # Broadcast multiply over channels in the native dtype (VPU).
    o_ref[...] = x * q.astype(x.dtype)


def _round_up(n, m):
    return (n + m - 1) // m * m


def _choose_spatial_tile(S, C, itemsize):
    # S is already a multiple-of-128-friendly size here (>= 128).
    # Live VMEM ~= 2x double-buffered input + 2x output blocks = 4 * C * T * itemsize.
    # 8 MiB budget keeps comfortable headroom under the v5e 16 MiB scoped default
    # and v7x's 64 MiB physical / 32 MiB scoped VMEM.
    budget = 8 * 1024 * 1024
    t_cap = budget // (4 * max(C, 1) * itemsize)
    t_cap = max(128, (t_cap // 128) * 128)
    t_cap = min(t_cap, 2048)                     # measured sweet spot: 512-2048 lanes
    # Keep T <= S (multiple of 128) so only the final grid step is a partial block.
    t_max_in_bounds = max(128, (S // 128) * 128)
    return min(t_cap, t_max_in_bounds)


def sse_forward(x, weight):
    """sSE forward pass. x: (B, C, H, W); weight: (1, C, 1, 1) bias-free conv weight."""
    B, C, H, W = x.shape
    S = H * W
    dtype = x.dtype
    itemsize = jnp.dtype(dtype).itemsize

    # Lane-dense, contiguous layout: (B, C, H, W) -> (B, C, S) (free reshape).
    x_flat = x.reshape(B, C, S)

    # Only tiny spatial extents get an explicit pad (keeps lane dim >= 128);
    # everything else relies on Pallas boundary masking for the ragged tail,
    # avoiding a full HBM pad copy.
    S_work = S
    if S < 128:
        S_work = 128
        x_flat = jnp.pad(x_flat, ((0, 0), (0, 0), (0, S_work - S)))

    T = _choose_spatial_tile(S_work, C, itemsize)
    n_s = pl.cdiv(S_work, T)

    w2d = weight.reshape(1, C).astype(dtype)

    out_flat = pl.pallas_call(
        _sse_kernel,
        out_shape=jax.ShapeDtypeStruct((B, C, S_work), dtype),
        grid_spec=pltpu.PrefetchScalarGridSpec(
            num_scalar_prefetch=0,
            grid=(B, n_s),
            in_specs=[
                # tiny weight, same block every step (stays resident in VMEM)
                pl.BlockSpec((1, C), lambda b, s: (0, 0)),
                # batch dim squeezed (None); kernel sees (C, T)
                pl.BlockSpec((None, C, T), lambda b, s: (b, 0, s)),
            ],
            out_specs=pl.BlockSpec((None, C, T), lambda b, s: (b, 0, s)),
        ),
        compiler_params=pltpu.CompilerParams(
            # Both axes independent (no cross-tile accumulation): lets v7x's two
            # TensorCores shard the grid of this memory-bound kernel.
            dimension_semantics=("parallel", "parallel"),
        ),
    )(w2d, x_flat)

    if S_work != S:
        out_flat = out_flat[:, :, :S]
    return out_flat.reshape(B, C, H, W)


def sse_reference(x, weight):
    # pure-JAX reference for sanity check
    w = weight.reshape(1, -1, 1, 1)                          # (1, C, 1, 1)
    q = jax.nn.sigmoid(jnp.sum(x * w, axis=1, keepdims=True))
    return x * q


if __name__ == "__main__":
    key = jax.random.PRNGKey(0)
    kx, kw, kx2, kw2 = jax.random.split(key, 4)

    # Case 1: small, lane-aligned spatial size (H*W = 256).
    B, C, H, W = 2, 4, 16, 16
    x = jax.random.normal(kx, (B, C, H, W), dtype=jnp.float32)
    bound = 1.0 / (C ** 0.5)                                 # kaiming-uniform-like, k=1
    weight = jax.random.uniform(kw, (1, C, 1, 1), jnp.float32, -bound, bound)

    out = jax.block_until_ready(sse_forward(x, weight))
    ref = sse_reference(x, weight)
    assert out.shape == (B, C, H, W)
    assert jnp.allclose(out, ref, atol=1e-5, rtol=1e-5)

    # Case 2: ragged spatial size / odd channel count (exercises small-S pad path).
    B2, C2, H2, W2 = 1, 5, 10, 7
    x2 = jax.random.normal(kx2, (B2, C2, H2, W2), dtype=jnp.float32)
    bound2 = 1.0 / (C2 ** 0.5)
    weight2 = jax.random.uniform(kw2, (1, C2, 1, 1), jnp.float32, -bound2, bound2)

    out2 = jax.block_until_ready(sse_forward(x2, weight2))
    ref2 = sse_reference(x2, weight2)
    assert out2.shape == (B2, C2, H2, W2)
    assert jnp.allclose(out2, ref2, atol=1e-5, rtol=1e-5)

    # Case 3: large ragged spatial size (exercises the mask-don't-pad path,
    # grid does not divide S evenly, no extra HBM pad copy).
    B3, C3, H3, W3 = 2, 8, 23, 29                            # S = 667
    kx3, kw3 = jax.random.split(kw2)
    x3 = jax.random.normal(kx3, (B3, C3, H3, W3), dtype=jnp.float32)
    bound3 = 1.0 / (C3 ** 0.5)
    weight3 = jax.random.uniform(kw3, (1, C3, 1, 1), jnp.float32, -bound3, bound3)

    out3 = jax.block_until_ready(sse_forward(x3, weight3))
    ref3 = sse_reference(x3, weight3)
    assert out3.shape == (B3, C3, H3, W3)
    assert jnp.allclose(out3, ref3, atol=1e-5, rtol=1e-5)

    print("KERNEL_OK")
</pallas_src>

<mosaic_0001>
module attributes {stable_mosaic.version = 11 : i64} {
  func.func @_sse_kernel(%arg0: i32, %arg1: i32, %arg2: memref<1x4xf32, #tpu.memory_space<vmem>>, %arg3: memref<1x4x256xf32, #tpu.memory_space<vmem>>, %arg4: memref<1x4x256xf32, #tpu.memory_space<vmem>>) attributes {dimension_semantics = [#tpu.dimension_semantics<parallel>, #tpu.dimension_semantics<parallel>], iteration_bounds = array<i64: 2, 1>, scalar_prefetch = 0 : i64, scratch_operands = 0 : i64, tpu.core_type = #tpu.core_type<tc>, window_params = [{pipeline_mode = #tpu.pipeline_mode<synchronous>, transform_indices = @transform_0, window_bounds = array<i64: 1, 4>}, {transform_indices = @transform_1, window_bounds = array<i64: 1, 4, 256>}, {transform_indices = @transform_2, window_bounds = array<i64: 1, 4, 256>}]} {
    %c0 = arith.constant 0 : index
    %c0_0 = arith.constant 0 : index
    %c0_1 = arith.constant 0 : index
    %0 = vector.load %arg3[%c0, %c0_0, %c0_1] : memref<1x4x256xf32, #tpu.memory_space<vmem>>, vector<1x4x256xf32>
    %1 = vector.shape_cast %0 : vector<1x4x256xf32> to vector<4x256xf32>
    %c0_2 = arith.constant 0 : index
    %c0_3 = arith.constant 0 : index
    %2 = vector.load %arg2[%c0_2, %c0_3] : memref<1x4xf32, #tpu.memory_space<vmem>>, vector<1x4xf32>
    %cst = arith.constant dense<0.000000e+00> : vector<1x256xf32>
    %3 = tpu.matmul %2, %1, %cst {dimension_numbers = #tpu.dot_dimension_numbers<[1], [0], [0], [1], [0, 0, 1, 1], [], []>} : vector<1x4xf32>, vector<4x256xf32>, vector<1x256xf32> -> vector<1x256xf32>
    %4 = arith.negf %3 : vector<1x256xf32>
    %5 = math.exp %4 : vector<1x256xf32>
    %cst_4 = arith.constant 1.000000e+00 : f32
    %6 = vector.broadcast %cst_4 : f32 to vector<1x256xf32>
    %7 = arith.addf %6, %5 : vector<1x256xf32>
    %8 = arith.divf %6, %7 : vector<1x256xf32>
    %9 = vector.broadcast %8 : vector<1x256xf32> to vector<4x256xf32>
    %10 = arith.mulf %1, %9 : vector<4x256xf32>
    %c0_5 = arith.constant 0 : index
    %c0_6 = arith.constant 0 : index
    %c0_7 = arith.constant 0 : index
    %11 = vector.load %arg4[%c0_5, %c0_6, %c0_7] : memref<1x4x256xf32, #tpu.memory_space<vmem>>, vector<1x4x256xf32>
    %12 = vector.shape_cast %11 : vector<1x4x256xf32> to vector<4x256xf32>
    %13 = vector.shape_cast %10 : vector<4x256xf32> to vector<1x4x256xf32>
    tpu.vector_store %arg4[%c0_5, %c0_6, %c0_7], %13 {strides = array<i32>} : memref<1x4x256xf32, #tpu.memory_space<vmem>>, vector<1x4x256xf32>,
    return
  }
  func.func @transform_0(%arg0: i32, %arg1: i32) -> (i32, i32) {
    %c0_i32 = arith.constant 0 : i32
    %c0_i32_0 = arith.constant 0 : i32
    %c0_i32_1 = arith.constant 0 : i32
    return %c0_i32, %c0_i32_0 : i32, i32
  }
  func.func @transform_1(%arg0: i32, %arg1: i32) -> (i32, i32, i32) {
    %c0_i32 = arith.constant 0 : i32
    %c0_i32_0 = arith.constant 0 : i32
    return %arg0, %c0_i32, %arg1 : i32, i32, i32
  }
  func.func @transform_2(%arg0: i32, %arg1: i32) -> (i32, i32, i32) {
    %c0_i32 = arith.constant 0 : i32
    %c0_i32_0 = arith.constant 0 : i32
    return %arg0, %c0_i32, %arg1 : i32, i32, i32
  }
}

</mosaic_0001>

<bundles_post_ra>
// kernel: tpu_custom_call.1
= control target key start
LH: loop header
LB: loop body
LE: loop exit
PB: predicated region body
PF: predicated region fallthrough
CT: control target
= control target key end

     0   :  { %7 = vsyncpa [#allocation3], 0  ;;  %s847_s0 = inlined_call_operand.hbm [shape: f32[1,4], index: 0, kind: input, shape index: {}]   ;;  %s848_s1 = inlined_call_operand.hbm [shape: f32[2,4,256], index: 1, kind: input, shape index: {}]   ;;  %s849_s2 = inlined_call_operand.hbm [shape: f32[2,4,256], index: 2, kind: output, shape index: {}]  }
   0x1   :  { %8 = vsyncpa [#allocation6], 0 }
   0x2   :  { %10 = vsyncpa [#allocation6 + $0x1], 0 }
   0x3   :  { %11 = vsyncpa [#allocation4], 0 }
   0x4   :  { %13 = vsyncpa [#allocation4 + $0x1], 0  ;;  %s682_s9 = smov 0   ;;  %s684_s10 = smov 0  }
   0x5   :  { %s686_s11 = smov 0   ;;  %s688_s12 = smov 0  }
   0x6   :  { %s690_s13 = smov 0   ;;  %s692_s14 = smov 0  }
   0x7 LB: > { %s416_s15 = sadd.s32 4294967295, %s661_s14   ;;  %s417_s16 = sadd.s32 4294967294, %s661_s14   ;;  %s661_s14 = sphi %s692_s14, %s19_s14   ;;  %s657_s13 = sphi %s690_s13, %s866_s13   ;;  %s653_s12 = sphi %s688_s12, %s865_s12   ;;  %s649_s11 = sphi %s686_s11, %s864_s11   ;;  %s645_s10 = sphi %s684_s10, %s863_s10   ;;  %s641_s9 = sphi %s682_s9, %s862_s9  }
   0x8   : > { %p74_p0 = scmp.ne.s32.totalorder %s645_s10, %s641_s9  ;;  %p716_p1 = scmp.eq.s32.totalorder %s416_s15, 0 }
   0x9   : > { %p720_p2 = scmp.eq.s32.totalorder %s416_s15, 1  ;;  %p106_p3 = scmp.eq.s32.totalorder %s417_s16, 1 }
   0xa   : > { %p726_p4 = por %p716_p1, %p74_p0  ;;  %p418_p5 = scmp.ge.s32.totalorder %s661_s14, 1 }
   0xb   : > { %p731_p6 = por %p106_p3, %p74_p0  ;;  %p113_p7 = scmp.lt.s32.totalorder %s661_s14, 3 }
   0xc   : > { %s853_s19 = scalar_select %p726_p4, 1, 0 }
   0xd   : > { %s854_s20 = scalar_select %p731_p6, 1, 0 }
   0xe   : > { %p736_p8 = pnand %p418_p5, %p113_p7  ;;  %s663_s22 = smov [#allocation2]  }
   0xf   : > { %s126_s23 = sshll.u32 %s663_s22, 4  ;;  %s31_s25 = sadd.s32 1, %s657_s13  ;;  %s127_s23 = int_to_ptr.vmem [resolvable:$true] %s126_s23 }
  0x10   : > { %p448_p10 = pneg %p736_p8  ;;  %s61_s26 = sadd.s32 1, %s649_s11 }
  0x11   : > { %p33_p12 = scmp.ge.s32.totalorder %s31_s25, 2  ;;  %s534_s27 = scalar_lea.vmem %s127_s23, 16 }
  0x12   : > { %p745_p11 = pnand %p448_p10, %p716_p1  ;;  %p535_p0 = scmp.ne.s32.totalorder %s127_s23, %s534_s27 }
  0x13   : > { %s541_s28 = scalar_lea.vmem %s127_s23, 32  ;;  %p542_p7 = scmp.lt.s32.totalorder %s127_s23, %s127_s23 }
  0x14   : > { %p525_p13 = pneg %p745_p11  ;;  %p543_p9 = scmp.lt.s32.totalorder %s541_s28, %s534_s27 }
  0x16   : > { %p537_p3 = pnand %p535_p0, %p525_p13  ;;  %p544_p6 = por %p543_p9, %p542_p7 }
  0x18   : > { %p538_p5 = pneg %p537_p3 }
  0x1a   : > { %p545_p4 = pnand %p544_p6, %p538_p5 }
  0x1c   : > { %548 = shalt.err (!%p545_p4)
}
  0x1d   : > { %451 = dma.hbm_to_vmem [thread:$0]  (!%p745_p11), %s847_s0, 16, %s127_s23, [#allocation3]  }
  0x1e   : > { %s868_s25 = smov (%p33_p12, %s31_s25), 0  ;;  %p68_p6 = scmp.ne.s32.totalorder %s649_s11, %s645_s10 }
  0x1f   : > { %p69_p4 = scmp.eq.s32.totalorder %s661_s14, 0  ;;  %s56_s3 = ssub.s32 %s657_s13, %s868_s25 }
  0x20   : > { %p461_p9 = scmp.lt.s32.totalorder %s661_s14, 2  ;;  %p59_p10 = scmp.eq.s32.totalorder %s56_s3, 0 }
  0x21   : > { %p70_p13 = por %p69_p4, %p68_p6  ;;  %p768_p0 = por %p720_p2, %p68_p6 }
  0x22   : > { %s137_s5 = sand.u32 1, %s649_s11   ;;  %s438_s8 = sshll.u32 %s657_s13, 7 }
  0x23   : > { %s774_s6 = scalar_select %p59_p10, %s649_s11, %s61_s26  }
  0x24   : > { %s421_s7 = sshll.u32 %s137_s5, 3  ;;  %s149_s22 = scalar_lea.hbm %s848_s1, %s438_s8 }
  0x25   : > { %s141_s23 = scalar_lea.vmem [#allocation5], %s421_s7  ;;  %p780_p11 = pnand %p461_p9, %p70_p13 }
  0x26   : > { %s151_s24 = sshll.u32 %s141_s23, 4  ;;  %s138_s18 = scalar_lea.sflag [#allocation6], %s137_s5  ;;  %s152_s24 = int_to_ptr.vmem [resolvable:$true] %s151_s24 }
  0x27   : > { %p551_p2 = pneg %p780_p11  ;;  %s562_s28 = scalar_lea.vmem %s152_s24, 128 }
  0x28   : > { %p563_p12 = scmp.ne.s32.totalorder %s152_s24, %s562_s28  ;;  %s664_s26 = smov [#allocation5]  }
  0x29   : > { %s567_s29 = sshll.u32 %s664_s26, 4  ;;  %s568_s29 = int_to_ptr.vmem [resolvable:$false] %s567_s29 }
  0x2a   : > { %p565_p3 = pnand %p563_p12, %p551_p2  ;;  %s569_s30 = scalar_lea.vmem %s568_s29, 256 }
  0x2b   : > { %p570_p7 = scmp.lt.s32.totalorder %s152_s24, %s568_s29  ;;  %p571_p6 = scmp.lt.s32.totalorder %s569_s30, %s562_s28 }
  0x2c   : > { %p566_p5 = pneg %p565_p3 }
  0x2d   : > { %p572_p4 = por %p571_p6, %p570_p7 }
  0x2f   : > { %p573_p10 = pnand %p572_p4, %p566_p5 }
  0x31   : > { %576 = shalt.err (!%p573_p10)
}
  0x32   : > { %455 = dma.hbm_to_vmem [thread:$0]  (!%p780_p11), %s149_s22, 128, %s152_s24, %s138_s18  }
  0x33   : > { %160 = sbr.rel (%p736_p8) target bundleno = 312 (0x138), region = 28 }
  0x38   : > { %628 = dma.done.wait (%p716_p1), [#allocation3], 16  }
  0x39   : > { %630 = vsyncadd (%p716_p1), [#allocation3], 4294967280  ;;  %s795_s3 = sand.u32 1, %s645_s10   ;;  %p859_p9 = scmp.ne.s32.totalorder %s853_s19, 0 }
  0x3a   : > { %s426_s5 = sshll.u32 %s795_s3, 3  ;;  %s167_s7 = scalar_lea.sflag [#allocation6], %s795_s3 }
  0x3b   : > { %s170_s8 = scalar_lea.vmem [#allocation5], %s426_s5 }
  0x3c   : > { %632 = dma.done.wait (%p859_p9), %s167_s7, 128  }
  0x3d   : > { %634 = vsyncadd (%p859_p9), %s167_s7, 4294967168  ;;  %v665_v0 = vmov 0.0   ;;  %v193_v1 = vld [vmem:[%s170_s8] sm:$0xff]  ;;  %vm201_vm0 = vcmask 1043456   ;;  %v194_v3 = vld [vmem:[#allocation2] sm:$0x1]  ;;  %v289_v12 = vlaneseq }
  0x3e   : > { %270 = vmatprep.mubr.f32.mxu0 %v665_v0  ;;  %v196_v2 = vcombine.high %v193_v1, %v193_v1  ;;  %vm197_vm1 = vcmask 31744   ;;  %s439_s17 = sshll.u32 %s653_s12, 7  ;;  %s190_s19 = scalar_lea.vmem [#allocation7], %s426_s5 }
  0x3f   : > { %v290_v13 = vshrl.u32 %v289_v12, 7  ;;  %s320_s21 = sshll.u32 %s190_s19, 4  ;;  %s318_s22 = scalar_lea.hbm %s849_s2, %s439_s17  ;;  %s321_s21 = int_to_ptr.vmem [resolvable:$true] %s320_s21 }
  0x40   : > { %428 = vmatprep.subr.msk.mxu0 %vm201_vm0, %v196_v2  ;;  %s304_s23 = scalar_lea.sflag [#allocation4], %s795_s3  ;;  %s577_s24 = scalar_lea.vmem %s321_s21, 128 }
  0x41   : > { %429 = vmatpush1.msk.msra.mxu0 %vm201_vm0, %v193_v1  ;;  %v291_v14 = vsub.s32 0, %v290_v13  ;;  %p578_p1 = scmp.ne.s32.totalorder %s321_s21, %s577_s24  ;;  %s666_s27 = smov [#allocation7]  }
  0x42   : > { %430 = vmatmul.mubr.msk.f32.vlgmr.msra.gmra.mxu0 %vm197_vm1, %v194_v3  ;;  %s581_s18 = sshll.u32 %s666_s27, 4  ;;  %s582_s18 = int_to_ptr.vmem [resolvable:$false] %s581_s18 }
  0x43   : > { %p579_p8 = pnand %p578_p1, %p768_p0  ;;  %s583_s12 = scalar_lea.vmem %s582_s18, 256 }
  0x44   : > { %p584_p11 = scmp.lt.s32.totalorder %s321_s21, %s582_s18  ;;  %p585_p2 = scmp.lt.s32.totalorder %s583_s12, %s577_s24 }
  0x45   : > { %p580_p13 = pneg %p579_p8 }
  0x46   : > { %p586_p12 = por %p585_p2, %p584_p11 }
  0x48   : > { %p587_p3 = pnand %p586_p12, %p580_p13 }
 0x102   : > { %v272_v4 = vpop.f32.mrf.mxu0 }
 0x103   : > { %v431_v5 = vmul.f32 -1.442695, %v272_v4 }
 0x104   : > { %v274_v6 = vpop.f32.mrf.mxu0 }
 0x105   : > { %515 = vpow2.f32 %v431_v5  ;;  %v432_v7 = vmul.f32 -1.442695, %v274_v6 }
 0x107   : > { %517 = vpow2.f32 %v432_v7 }
 0x112   : > { %v516_v8 = vpop.eup %515 }
 0x113   : > { %v283_v9 = vadd.f32 1.0, %v516_v8 }
 0x114   : > { %v518_v10 = vpop.eup %517 }
 0x115   : > { %519 = vrcp.f32 %v283_v9  ;;  %v284_v11 = vadd.f32 1.0, %v518_v10 }
 0x117   : > { %521 = vrcp.f32 %v284_v11 }
 0x122   : > { %v520_v15 = vpop.eup %519 }
 0x123   : > { %v292_v17 = vrot.slane %v520_v15, %v291_v14 }
 0x124   : > { %v522_v16 = vpop.eup %521 }
 0x125   : > { %v296_v18 = vrot.slane %v522_v16, %v291_v14 }
 0x127   : > { %v299_v19 = vcombine.low %v292_v17, %v296_v18 }
 0x129   : > { %v301_v20 = vmul.f32 %v299_v19, %v193_v1 }
 0x12b   : > { %302 = vst [vmem:[%s190_s19] sm:$0xff] %v301_v20 }
 0x12c   : > { %590 = shalt.err (!%p587_p3)
}
 0x12d   : > { %s591_s28 = scalar_lea.hbm %s318_s22, 128  ;;  %s595_s30 = scalar_lea.hbm %s849_s2, 256 }
 0x12e   : > { %p592_p5 = scmp.ne.s32.totalorder %s318_s22, %s591_s28  ;;  %p596_p4 = scmp.lt.s32.totalorder %s318_s22, %s849_s2 }
 0x12f   : > { %p597_p10 = scmp.lt.s32.totalorder %s595_s30, %s591_s28 }
 0x130   : > { %p593_p7 = pnand %p592_p5, %p768_p0 }
 0x131   : > { %p598_p9 = por %p597_p10, %p596_p4 }
 0x132   : > { %p594_p6 = pneg %p593_p7 }
 0x134   : > { %p599_p1 = pnand %p598_p9, %p594_p6 }
 0x136   : > { %602 = shalt.err (!%p599_p1)
}
 0x137   : > { %446 = dma.vmem_to_hbm [thread:$0]  (%p768_p0), %s321_s21, 128, %s318_s22, %s304_s23  }
 0x138 PF: > { %s332_s7 = sand.u32 1, %s641_s9   ;;  %p860_p8 = scmp.ne.s32.totalorder %s854_s20, 0 }
 0x139   : > { %p861_p13 = scmp.ge.s32.totalorder %s661_s14, 2  ;;  %s333_s8 = scalar_lea.sflag [#allocation4], %s332_s7 }
 0x13b   : > { %p457_p11 = pnand %p861_p13, %p860_p8 }
 0x13d   : > { %p458_p2 = pneg %p457_p11 }
 0x13f   : > { %636 = dma.done.wait (%p458_p2), %s333_s8, 128  }
 0x140   : > { %638 = vsyncadd (%p458_p2), %s333_s8, 4294967168  ;;  %s19_s14 = sadd.s32 1, %s661_s14   ;;  %s862_s9 = smov %s645_s10 }
 0x141   : > { %p16_p12 = scmp.ge.s32.totalorder %s19_s14, 4   ;;  %s863_s10 = smov %s649_s11 }
 0x142   : > { %s864_s11 = smov %s774_s6  ;;  %s865_s12 = smov %s657_s13 }
 0x143   : > { %s866_s13 = smov %s868_s25  ;;  %18 = sbr.rel (!%p16_p12) target bundleno = 7 (0x7), region = 78 }
 0x148   :  { %338 = vsyncpa [#allocation3], 1 }
 0x149   :  { %340 = vsyncpa [#allocation3 + $0x1], 1 }
 0x14a   :  { %341 = vsyncpa [#allocation6], 1 }
 0x14b   :  { %343 = vsyncpa [#allocation6 + $0x1], 1 }
 0x14c   :  { %344 = vsyncpa [#allocation4], 1 }
 0x14d   :  { %346 = vsyncpa [#allocation4 + $0x1], 1 }

</bundles_post_ra>
